<compile_context>
chip_gen: v7x
topology: tpu7x:2x2x1
jax: 0.10.0
libtpu: 0.0.40
codegen_flags: <defaults>
</compile_context>

<pallas_src>
import functools

import jax
import jax.numpy as jnp
import numpy as np
from jax.experimental import pallas as pl
from jax.experimental.pallas import tpu as pltpu


def _fused_butterfly_matrix(cw):
    """(2*cw, 2*cw) constant fused Haar butterfly, entries in {0, +-0.5}.

    Input lanes:  [even-H-row columns (cw) | odd-H-row columns (cw)] of one chunk.
    Output lanes: [LL (cw/2) | HL (cw/2) | LH (cw/2) | HH (cw/2)], 1/2 scale folded in.
    """
    h = cw // 2
    m = np.zeros((2 * cw, 2 * cw), np.float32)
    j = np.arange(h)
    re, ro = 2 * j, 2 * j + 1            # even H-row, even/odd W column  -> x1 / x3
    oe, oo = cw + 2 * j, cw + 2 * j + 1  # odd  H-row, even/odd W column  -> x2 / x4
    # LL = x1 + x2 + x3 + x4
    m[re, j] = 0.5
    m[ro, j] = 0.5
    m[oe, j] = 0.5
    m[oo, j] = 0.5
    # HL = -x1 - x2 + x3 + x4
    m[re, h + j] = -0.5
    m[ro, h + j] = 0.5
    m[oe, h + j] = -0.5
    m[oo, h + j] = 0.5
    # LH = -x1 + x2 - x3 + x4
    m[re, cw + j] = -0.5
    m[ro, cw + j] = -0.5
    m[oe, cw + j] = 0.5
    m[oo, cw + j] = 0.5
    # HH = x1 - x2 - x3 + x4
    m[re, 3 * h + j] = 0.5
    m[ro, 3 * h + j] = -0.5
    m[oe, 3 * h + j] = -0.5
    m[oo, 3 * h + j] = 0.5
    return m


def _mxu_is_wide():
    """True if the attached TPU has 256x256 MXUs (v6e / v7x); False for v2..v5."""
    try:
        kind = jax.devices()[0].device_kind.lower()
    except Exception:
        return True
    return not any(tag in kind for tag in ("v2", "v3", "v4", "v5"))


def _pick_col_chunk(w, target):
    """Largest even divisor of w that is <= target (prefers target itself)."""
    if w % target == 0:
        return target
    for cand in range(min(w, target), 1, -1):
        if w % cand == 0 and cand % 2 == 0:
            return cand
    return w


def _pick_row_tile(rows, bytes_per_row, budget_bytes, sublane):
    """Largest sublane-aligned divisor of `rows` whose input block fits the budget."""
    target = max(1, budget_bytes // max(1, bytes_per_row))
    if target >= rows:
        return rows
    aligned = [d for d in range(sublane, rows, sublane) if rows % d == 0]
    below = [d for d in aligned if d <= target]
    if below:
        return below[-1]
    if aligned:
        return aligned[0]
    return rows  # no aligned divisor: use the full extent (keeps the BlockSpec legal)


def _apply_butterfly(chunk, bmat):
    """chunk:(m, 2*scw) float -> (m, 2*scw) f32 via the constant bf16 butterfly matrix.

    f32 (and f16) inputs use an exact bf16x3 split of the operand; the three split
    terms are lane-concatenated and contracted against the 3x row-stacked matrix so
    the accumulation happens inside the MXU (entries {0,+-0.5} make every product
    exact; only the f32 accumulator adds round).  bf16 inputs use a single matmul.
    """
    if chunk.dtype == jnp.bfloat16:
        return jnp.dot(chunk, bmat, preferred_element_type=jnp.float32)
    v = chunk.astype(jnp.float32)
    v0 = v.astype(jnp.bfloat16)
    r1 = v - v0.astype(jnp.float32)
    v1 = r1.astype(jnp.bfloat16)
    v2 = (r1 - v1.astype(jnp.float32)).astype(jnp.bfloat16)
    v3 = jnp.concatenate([v0, v1, v2], axis=-1)
    return jnp.dot(v3, bmat, preferred_element_type=jnp.float32)


def _dwt_block(xa, xb, bmat, scw):
    """Haar DWT of one row tile.

    xa, xb: (rt, wt) even / odd H-row columns (wt a multiple of scw).
    Returns (LL, HL, LH, HH), each (rt, wt // 2), fully lane-assembled so the caller
    can issue one dense store per subband.
    """
    rt, wt = xa.shape
    n_sub = wt // scw
    hb = scw // 2
    if n_sub == 1:
        chunk = jnp.concatenate([xa, xb], axis=-1)
    else:
        # Stack the column sub-chunks along sublanes: one tall matmul instead of
        # n_sub small ones (fewer weight pushes, same FLOPs).
        chunk = jnp.concatenate(
            [jnp.concatenate([xa[:, s * scw:(s + 1) * scw],
                              xb[:, s * scw:(s + 1) * scw]], axis=-1)
             for s in range(n_sub)],
            axis=0)
    res = _apply_butterfly(chunk, bmat)  # (n_sub*rt, 2*scw) = [LL|HL|LH|HH] per sub-chunk

    def band(k):
        if n_sub == 1:
            return res[:, k * hb:(k + 1) * hb]
        return jnp.concatenate(
            [res[s * rt:(s + 1) * rt, k * hb:(k + 1) * hb] for s in range(n_sub)],
            axis=-1)

    return band(0), band(1), band(2), band(3)


def _dwt_kernel_cols(bmat_ref, xe_ref, xo_ref, ll_ref, hi_ref, *, scw):
    """Fast path: one (batch, row-tile, 256-column-tile) grid step, dense stores."""
    xa = xe_ref[0, :, :]  # (rt, 256) even H-rows
    xb = xo_ref[0, :, :]  # (rt, 256) odd  H-rows
    ll, hl, lh, hh = _dwt_block(xa, xb, bmat_ref[...], scw)
    ll_ref[0, :, :] = ll.astype(ll_ref.dtype)
    hi_ref[0, 0, :, :] = hl.astype(hi_ref.dtype)
    hi_ref[0, 1, :, :] = lh.astype(hi_ref.dtype)
    hi_ref[0, 2, :, :] = hh.astype(hi_ref.dtype)


def _dwt_kernel_full(bmat_ref, x_ref, ll_ref, hi_ref, *, w, scw):
    """Fallback path (W not a multiple of 256): full image width per grid step."""
    xa = x_ref[0, :, :w]   # even H-rows
    xb = x_ref[0, :, w:]   # odd  H-rows
    ll, hl, lh, hh = _dwt_block(xa, xb, bmat_ref[...], scw)
    ll_ref[0, :, :] = ll.astype(ll_ref.dtype)
    hi_ref[0, 0, :, :] = hl.astype(hi_ref.dtype)
    hi_ref[0, 1, :, :] = lh.astype(hi_ref.dtype)
    hi_ref[0, 2, :, :] = hh.astype(hi_ref.dtype)


def dwt_forward(x):
    """Pallas TPU implementation of dwt_init / DWT.forward.

    x: (B, C, H, W) float array, H and W even.
    returns: (x_LL, x_high) with shapes (B, C, H/2, W/2) and (B, 3C, H/2, W/2).
    """
    b, c, h, w = x.shape
    if h % 2 or w % 2:
        raise ValueError("H and W must both be even")
    h2, w2 = h // 2, w // 2
    rows = c * h2
    itemsize = x.dtype.itemsize
    sublane = 16 if itemsize == 2 else 8
    wide_mxu = _mxu_is_wide()

    # Free, contiguous reshape: row r = (c, h2); last dim = [even H-row | odd H-row].
    xr = x.reshape(b, rows, 2 * w)

    if w % 256 == 0:
        # Fast path: 256 input columns per grid step -> 128-lane-dense output blocks.
        cwt = 256
        scw = 128 if wide_mxu else 64   # contraction width matched to the MXU size
        n_col = w // cwt
        r_tile = _pick_row_tile(rows, 2 * cwt * itemsize,
                                budget_bytes=4 << 20, sublane=sublane)
    else:
        # Fallback: full width per step; never build a (W, W) constant matrix.
        cwt = w
        scw = _pick_col_chunk(w, 128 if wide_mxu else 64)
        n_col = 1
        r_tile = _pick_row_tile(rows, 2 * w * itemsize,
                                budget_bytes=2 << 20, sublane=sublane)

    n_row = rows // r_tile
    if b * n_row * n_col < 2 and rows % 2 == 0 and (rows // 2) % sublane == 0:
        # Expose >= 2 "parallel" grid steps so both v7x TensorCores get work.
        r_tile = rows // 2
        n_row = 2

    bmat_np = _fused_butterfly_matrix(scw)
    if x.dtype != jnp.bfloat16:
        # Row-stack 3x so the bf16x3 split terms accumulate inside the MXU.
        bmat_np = np.concatenate([bmat_np] * 3, axis=0)
    bmat = jnp.asarray(bmat_np, dtype=jnp.bfloat16)

    out_shape = (
        jax.ShapeDtypeStruct((b, rows, w2), x.dtype),
        jax.ShapeDtypeStruct((b, 3, rows, w2), x.dtype),
    )

    if w % 256 == 0:
        kernel = functools.partial(_dwt_kernel_cols, scw=scw)
        grid = (b, n_row, n_col)
        in_specs = [
            # Constant butterfly matrix: same block every step -> stays resident.
            pl.BlockSpec(bmat.shape, lambda bi, ri, ci: (0, 0)),
            # Even-row columns of this 256-column tile.
            pl.BlockSpec((1, r_tile, cwt), lambda bi, ri, ci: (bi, ri, ci)),
            # Odd-row columns of the same tile (offset by w == n_col blocks).
            pl.BlockSpec((1, r_tile, cwt), lambda bi, ri, ci: (bi, ri, ci + n_col)),
        ]
        out_specs = (
            pl.BlockSpec((1, r_tile, cwt // 2), lambda bi, ri, ci: (bi, ri, ci)),
            pl.BlockSpec((1, 3, r_tile, cwt // 2), lambda bi, ri, ci: (bi, 0, ri, ci)),
        )
        operands = (bmat, xr, xr)
    else:
        kernel = functools.partial(_dwt_kernel_full, w=w, scw=scw)
        grid = (b, n_row)
        in_specs = [
            pl.BlockSpec(bmat.shape, lambda bi, ri: (0, 0)),
            pl.BlockSpec((1, r_tile, 2 * w), lambda bi, ri: (bi, ri, 0)),
        ]
        out_specs = (
            pl.BlockSpec((1, r_tile, w2), lambda bi, ri: (bi, ri, 0)),
            pl.BlockSpec((1, 3, r_tile, w2), lambda bi, ri: (bi, 0, ri, 0)),
        )
        operands = (bmat, xr)

    ll, hi = pl.pallas_call(
        kernel,
        out_shape=out_shape,
        grid=grid,
        in_specs=in_specs,
        out_specs=out_specs,
        compiler_params=pltpu.CompilerParams(
            dimension_semantics=("parallel",) * len(grid),
            # Double-buffered blocks + compiler temporaries stay well below this on
            # every generation; raises v5e's 16 MiB scoped-VMEM default.
            vmem_limit_bytes=48 * 1024 * 1024,
        ),
    )(*operands)

    # Free contiguous reshapes back to the PyTorch layouts.
    x_ll = ll.reshape(b, c, h2, w2)
    x_high = hi.reshape(b, 3 * c, h2, w2)  # == torch.cat((HL, LH, HH), dim=1)
    return x_ll, x_high


def dwt_reference(x):
    """Pure-JAX reference mirroring the PyTorch dwt_init."""
    x01 = x[:, :, 0::2, :] / 2
    x02 = x[:, :, 1::2, :] / 2
    x1 = x01[:, :, :, 0::2]
    x2 = x02[:, :, :, 0::2]
    x3 = x01[:, :, :, 1::2]
    x4 = x02[:, :, :, 1::2]
    x_LL = x1 + x2 + x3 + x4
    x_HL = -x1 - x2 + x3 + x4
    x_LH = -x1 + x2 - x3 + x4
    x_HH = x1 - x2 - x3 + x4
    return x_LL, jnp.concatenate((x_HL, x_LH, x_HH), axis=1)


if __name__ == "__main__":
    fwd = jax.jit(dwt_forward)

    # Small shape consistent with the module (fallback path, W % 256 != 0).
    B, C, H, W = 2, 4, 16, 16
    x = jax.random.normal(jax.random.PRNGKey(0), (B, C, H, W), dtype=jnp.float32)
    ll, high = fwd(x)
    jax.block_until_ready((ll, high))
    ll_ref, high_ref = dwt_reference(x)
    assert ll.shape == (B, C, H // 2, W // 2)
    assert high.shape == (B, 3 * C, H // 2, W // 2)
    assert jnp.allclose(ll, ll_ref, atol=1e-5, rtol=1e-5)
    assert jnp.allclose(high, high_ref, atol=1e-5, rtol=1e-5)

    # Second small shape that exercises the column-tiled fused-matmul fast path
    # (W % 256 == 0) with 128-lane-dense stores.
    Bw, Cw, Hw, Ww = 1, 2, 8, 512
    xw = jax.random.normal(jax.random.PRNGKey(0), (Bw, Cw, Hw, Ww), dtype=jnp.float32)
    llw, highw = fwd(xw)
    jax.block_until_ready((llw, highw))
    llw_ref, highw_ref = dwt_reference(xw)
    assert llw.shape == (Bw, Cw, Hw // 2, Ww // 2)
    assert highw.shape == (Bw, 3 * Cw, Hw // 2, Ww // 2)
    assert jnp.allclose(llw, llw_ref, atol=1e-5, rtol=1e-5)
    assert jnp.allclose(highw, highw_ref, atol=1e-5, rtol=1e-5)

    print("KERNEL_OK")
</pallas_src>

<mosaic_0001>
module attributes {stable_mosaic.version = 11 : i64} {
  func.func @_dwt_kernel_full(%arg0: i32, %arg1: i32, %arg2: memref<96x32xbf16, #tpu.memory_space<vmem>>, %arg3: memref<1x32x32xf32, #tpu.memory_space<vmem>>, %arg4: memref<1x32x8xf32, #tpu.memory_space<vmem>>, %arg5: memref<1x3x32x8xf32, #tpu.memory_space<vmem>>) attributes {dimension_semantics = [#tpu.dimension_semantics<parallel>, #tpu.dimension_semantics<parallel>], iteration_bounds = array<i64: 2, 1>, scalar_prefetch = 0 : i64, scratch_operands = 0 : i64, tpu.core_type = #tpu.core_type<tc>, window_params = [{pipeline_mode = #tpu.pipeline_mode<synchronous>, transform_indices = @transform_0, window_bounds = array<i64: 96, 32>}, {transform_indices = @transform_1, window_bounds = array<i64: 1, 32, 32>}, {transform_indices = @transform_2, window_bounds = array<i64: 1, 32, 8>}, {transform_indices = @transform_3, window_bounds = array<i64: 1, 3, 32, 8>}]} {
    %c0 = arith.constant 0 : index
    %c0_0 = arith.constant 0 : index
    %c0_1 = arith.constant 0 : index
    %0 = vector.load %arg3[%c0, %c0_0, %c0_1] : memref<1x32x32xf32, #tpu.memory_space<vmem>>, vector<1x32x16xf32>
    %1 = vector.shape_cast %0 : vector<1x32x16xf32> to vector<32x16xf32>
    %c0_2 = arith.constant 0 : index
    %c0_3 = arith.constant 0 : index
    %c16 = arith.constant 16 : index
    %2 = vector.load %arg3[%c0_2, %c0_3, %c16] : memref<1x32x32xf32, #tpu.memory_space<vmem>>, vector<1x32x16xf32>
    %3 = vector.shape_cast %2 : vector<1x32x16xf32> to vector<32x16xf32>
    %c0_4 = arith.constant 0 : index
    %c0_5 = arith.constant 0 : index
    %4 = vector.load %arg2[%c0_4, %c0_5] : memref<96x32xbf16, #tpu.memory_space<vmem>>, vector<96x32xbf16>
    %5 = tpu.concatenate %1, %3 in 1 : vector<32x16xf32>, vector<32x16xf32> -> vector<32x32xf32>
    %6 = arith.truncf %5 : vector<32x32xf32> to vector<32x32xbf16>
    %7 = arith.extf %6 : vector<32x32xbf16> to vector<32x32xf32>
    %8 = arith.subf %5, %7 : vector<32x32xf32>
    %9 = arith.truncf %8 : vector<32x32xf32> to vector<32x32xbf16>
    %10 = arith.extf %9 : vector<32x32xbf16> to vector<32x32xf32>
    %11 = arith.subf %8, %10 : vector<32x32xf32>
    %12 = arith.truncf %11 : vector<32x32xf32> to vector<32x32xbf16>
    %13 = tpu.concatenate %6, %9, %12 in 1 : vector<32x32xbf16>, vector<32x32xbf16>, vector<32x32xbf16> -> vector<32x96xbf16>
    %cst = arith.constant dense<0.000000e+00> : vector<32x32xf32>
    %14 = tpu.matmul %13, %4, %cst {dimension_numbers = #tpu.dot_dimension_numbers<[1], [0], [0], [1], [0, 0, 1, 1], [], []>} : vector<32x96xbf16>, vector<96x32xbf16>, vector<32x32xf32> -> vector<32x32xf32>
    %15 = vector.extract_strided_slice %14 {offsets = [0, 0], sizes = [32, 8], strides = [1, 1]} : vector<32x32xf32> to vector<32x8xf32>
    %16 = vector.extract_strided_slice %14 {offsets = [0, 8], sizes = [32, 8], strides = [1, 1]} : vector<32x32xf32> to vector<32x8xf32>
    %17 = vector.extract_strided_slice %14 {offsets = [0, 16], sizes = [32, 8], strides = [1, 1]} : vector<32x32xf32> to vector<32x8xf32>
    %18 = vector.extract_strided_slice %14 {offsets = [0, 24], sizes = [32, 8], strides = [1, 1]} : vector<32x32xf32> to vector<32x8xf32>
    %c0_6 = arith.constant 0 : index
    %c0_7 = arith.constant 0 : index
    %c0_8 = arith.constant 0 : index
    %19 = vector.load %arg4[%c0_6, %c0_7, %c0_8] : memref<1x32x8xf32, #tpu.memory_space<vmem>>, vector<1x32x8xf32>
    %20 = vector.shape_cast %19 : vector<1x32x8xf32> to vector<32x8xf32>
    %21 = vector.shape_cast %15 : vector<32x8xf32> to vector<1x32x8xf32>
    tpu.vector_store %arg4[%c0_6, %c0_7, %c0_8], %21 {strides = array<i32>} : memref<1x32x8xf32, #tpu.memory_space<vmem>>, vector<1x32x8xf32>,
    %c0_9 = arith.constant 0 : index
    %c0_10 = arith.constant 0 : index
    %c0_11 = arith.constant 0 : index
    %c0_12 = arith.constant 0 : index
    %22 = vector.load %arg5[%c0_9, %c0_10, %c0_11, %c0_12] : memref<1x3x32x8xf32, #tpu.memory_space<vmem>>, vector<1x1x32x8xf32>
    %23 = vector.shape_cast %22 : vector<1x1x32x8xf32> to vector<32x8xf32>
    %24 = vector.shape_cast %16 : vector<32x8xf32> to vector<1x1x32x8xf32>
    tpu.vector_store %arg5[%c0_9, %c0_10, %c0_11, %c0_12], %24 {strides = array<i32>} : memref<1x3x32x8xf32, #tpu.memory_space<vmem>>, vector<1x1x32x8xf32>,
    %c0_13 = arith.constant 0 : index
    %c1 = arith.constant 1 : index
    %c0_14 = arith.constant 0 : index
    %c0_15 = arith.constant 0 : index
    %25 = vector.load %arg5[%c0_13, %c1, %c0_14, %c0_15] : memref<1x3x32x8xf32, #tpu.memory_space<vmem>>, vector<1x1x32x8xf32>
    %26 = vector.shape_cast %25 : vector<1x1x32x8xf32> to vector<32x8xf32>
    %27 = vector.shape_cast %17 : vector<32x8xf32> to vector<1x1x32x8xf32>
    tpu.vector_store %arg5[%c0_13, %c1, %c0_14, %c0_15], %27 {strides = array<i32>} : memref<1x3x32x8xf32, #tpu.memory_space<vmem>>, vector<1x1x32x8xf32>,
    %c0_16 = arith.constant 0 : index
    %c2 = arith.constant 2 : index
    %c0_17 = arith.constant 0 : index
    %c0_18 = arith.constant 0 : index
    %28 = vector.load %arg5[%c0_16, %c2, %c0_17, %c0_18] : memref<1x3x32x8xf32, #tpu.memory_space<vmem>>, vector<1x1x32x8xf32>
    %29 = vector.shape_cast %28 : vector<1x1x32x8xf32> to vector<32x8xf32>
    %30 = vector.shape_cast %18 : vector<32x8xf32> to vector<1x1x32x8xf32>
    tpu.vector_store %arg5[%c0_16, %c2, %c0_17, %c0_18], %30 {strides = array<i32>} : memref<1x3x32x8xf32, #tpu.memory_space<vmem>>, vector<1x1x32x8xf32>,
    return
  }
  func.func @transform_0(%arg0: i32, %arg1: i32) -> (i32, i32) {
    %c0_i32 = arith.constant 0 : i32
    %c0_i32_0 = arith.constant 0 : i32
    %c0_i32_1 = arith.constant 0 : i32
    return %c0_i32, %c0_i32_0 : i32, i32
  }
  func.func @transform_1(%arg0: i32, %arg1: i32) -> (i32, i32, i32) {
    %c0_i32 = arith.constant 0 : i32
    %c0_i32_0 = arith.constant 0 : i32
    return %arg0, %arg1, %c0_i32 : i32, i32, i32
  }
  func.func @transform_2(%arg0: i32, %arg1: i32) -> (i32, i32, i32) {
    %c0_i32 = arith.constant 0 : i32
    %c0_i32_0 = arith.constant 0 : i32
    return %arg0, %arg1, %c0_i32 : i32, i32, i32
  }
  func.func @transform_3(%arg0: i32, %arg1: i32) -> (i32, i32, i32, i32) {
    %c0_i32 = arith.constant 0 : i32
    %c0_i32_0 = arith.constant 0 : i32
    %c0_i32_1 = arith.constant 0 : i32
    return %arg0, %c0_i32, %arg1, %c0_i32_0 : i32, i32, i32, i32
  }
}

</mosaic_0001>

<bundles_post_ra>
// kernel: dwt_forward.1
= control target key start
LH: loop header
LB: loop body
LE: loop exit
PB: predicated region body
PF: predicated region fallthrough
CT: control target
= control target key end

     0   :  { %9 = vsyncpa [#allocation3], 0  ;;  %s974_s0 = inlined_call_operand.vmem [shape: bf16[96,32], index: 0, kind: input, shape index: {}]   ;;  %s975_s1 = inlined_call_operand.vmem [shape: f32[2,32,32], index: 1, kind: input, shape index: {}]   ;;  %s976_s2 = inlined_call_operand.hbm [shape: f32[2,32,8], index: 2, kind: output, shape index: {0}]   ;;  %s977_s3 = inlined_call_operand.vmem [shape: f32[2,3,32,8], index: 3, kind: output, shape index: {1}]  }
   0x1   :  { %11 = vsyncpa [#allocation3 + $0x1], 0  ;;  %s814_s12 = smov 0   ;;  %s816_s13 = smov 0  }
   0x2   :  { %s818_s14 = smov 0   ;;  %s820_s15 = smov 0  }
   0x3   :  { %s822_s16 = smov 0   ;;  %s824_s17 = smov 0  }
   0x4 LB: > { %s581_s18 = sadd.s32 4294967295, %s784_s17   ;;  %s582_s19 = sadd.s32 4294967294, %s784_s17   ;;  %s784_s17 = sphi %s824_s17, %s17_s17   ;;  %s780_s16 = sphi %s822_s16, %s984_s16   ;;  %s776_s15 = sphi %s820_s15, %s983_s15   ;;  %s772_s14 = sphi %s818_s14, %s982_s14   ;;  %s768_s13 = sphi %s816_s13, %s981_s13   ;;  %s764_s12 = sphi %s814_s12, %s980_s12  }
   0x5   : > { %s29_s20 = sadd.s32 1, %s780_s16  ;;  %s87_s21 = sadd.s32 1, %s772_s14 }
   0x6   : > { %p31_p0 = scmp.ge.s32.totalorder %s29_s20, 2  ;;  %p97_p1 = scmp.ne.s32.totalorder %s772_s14, %s768_s13 }
   0x7   : > { %p98_p2 = scmp.eq.s32.totalorder %s581_s18, 1  ;;  %p103_p3 = scmp.ne.s32.totalorder %s768_s13, %s764_s12 }
   0x8   : > { %s986_s20 = smov (%p31_p0, %s29_s20), 0  ;;  %p104_p5 = scmp.eq.s32.totalorder %s582_s19, 1 }
   0x9   : > { %p854_p4 = por %p98_p2, %p97_p1  ;;  %s82_s23 = ssub.s32 %s780_s16, %s986_s20 }
   0xa   : > { %p585_p6 = scmp.ge.s32.totalorder %s784_s17, 1  ;;  %p85_p7 = scmp.eq.s32.totalorder %s82_s23, 0 }
   0xb   : > { %p861_p8 = por %p104_p5, %p103_p3  ;;  %p166_p9 = scmp.lt.s32.totalorder %s784_s17, 3 }
   0xc   : > { %s867_s25 = scalar_select %p85_p7, %s772_s14, %s87_s21  }
   0xd   : > { %p167_p10 = pnand %p585_p6, %p166_p9 }
   0xe   : > { %p204_p11 = scmp.lt.s32.totalorder (!%p167_p10), %s776_s15, 1  ;;  %v700_v0 = vld [vmem:[%s974_s0] sm:$0xff] (!%p167_p10)   ;;  %v701_v1 = vld [vmem:[%s974_s0 + $0x8] sm:$0xff] (!%p167_p10)   ;;  %v702_v2 = vld [vmem:[%s974_s0 + $0x10] sm:$0xff] (!%p167_p10)   ;;  %s786_s21 = smov (!%p167_p10), 32   ;;  %vm275_vm0 = vcmask (!%p167_p10), 261120  }
   0xf   : > { %170 = sbr.rel (%p167_p10) target bundleno = 520 (0x208), region = 28  ;;  %621 = vmatprep.subr.bf16.mxu0 (!%p167_p10), %v700_v0  ;;  %v703_v11 = vld [vmem:[%s974_s0 + $0x18] sm:$0xff] (!%p167_p10)   ;;  %v704_v19 = vld [vmem:[%s974_s0 + $0x20] sm:$0xff] (!%p167_p10)   ;;  %v705_v27 = vld [vmem:[%s974_s0 + $0x28] sm:$0xff] (!%p167_p10)   ;;  %s787_s27 = smov (!%p167_p10), 64   ;;  %vm282_vm1 = vcmask (!%p167_p10), 523264  }
  0x10   : > { %622 = vmatpush3.bf16.msra.mxu0 (!%p167_p10), %v700_v0  ;;  %vm323_vm2 = vcmask (!%p167_p10), 785408   ;;  %s189_s29 = sand.u32 (!%p167_p10), 1, %s768_s13   ;;  %vm377_vm3 = vcmask (!%p167_p10), 64512   ;;  %s788_s5 = smov (!%p167_p10), 120  }
  0x11   : > { %623 = vmatprep.subr.bf16.mxu0 (!%p167_p10), %v701_v1  ;;  %s586_s30 = sshll.u32 (!%p167_p10), %s189_s29, 5  ;;  %s789_s7 = smov (!%p167_p10), 112  }
  0x12   : > { %s612_s8 = sshll.u32 (!%p167_p10), %s776_s15, 9  ;;  %s910_s18 = scalar_lea.sflag (!%p167_p10), [#allocation3], %s189_s29 }
  0x13   : > { %s908_s11 = scalar_lea.hbm (!%p167_p10), %s976_s2, %s612_s8 }
  0x14   : > { %624 = vmatpush3.bf16.msra.mxu0 (!%p167_p10), %v701_v1 }
  0x15   : > { %625 = vmatprep.subr.bf16.mxu0 (!%p167_p10), %v702_v2 }
  0x16   : > { %s874_s28 = scalar_select %p204_p11, %s776_s15, 1 }
  0x18   : > { %s611_s4 = sshll.u32 %s874_s28, 5  ;;  %626 = vmatpush3.bf16.msra.mxu0 %v702_v2 }
  0x19   : > { %s211_s9 = scalar_lea.vmem %s975_s1, %s611_s4  ;;  %627 = vmatprep.subr.bf16.mxu0 %v703_v11  ;;  %s191_s4 = scalar_lea.vmem [#allocation2], %s586_s30 }
  0x1a   : > { %v225_v3 = vld [vmem:[%s211_s9] sm:$0xff]  ;;  %v226_v4 = vld [vmem:[%s211_s9 + $0x8] sm:$0xff]  ;;  %v227_v5 = vld [vmem:[%s211_s9 + $0x10] sm:$0xff]  ;;  %s461_s6 = sshll.u32 %s191_s4, 4  ;;  %s902_s6 = int_to_ptr.vmem [resolvable:$true] %s461_s6 }
  0x1b   : > { %v241_v6 = vpack.c.bf16 %v226_v4, %v225_v3  ;;  %v228_v7 = vld [vmem:[%s211_s9 + $0x18] sm:$0xff]  ;;  %s706_s19 = scalar_lea.vmem %s902_s6, 512 }
  0x1c   : > { %v242_v8 = vpack.c.bf16 %v228_v7, %v227_v5  ;;  %628 = vmatpush3.bf16.msra.mxu0 %v703_v11  ;;  %p707_p12 = scmp.ne.s32.totalorder %s902_s6, %s706_s19 }
  0x1d   : > { %v243_v9 = vunpack.c.l.bf16 %v241_v6  ;;  %v244_v10 = vunpack.c.h.bf16 %v241_v6  ;;  %629 = vmatprep.subr.bf16.mxu0 %v704_v19 }
  0x1e   : > { %v245_v12 = vunpack.c.l.bf16 %v242_v8  ;;  %v246_v13 = vunpack.c.h.bf16 %v242_v8  ;;  %p708_p13 = pnand %p707_p12, %p854_p4 }
  0x1f   : > { %v247_v14 = vsub.f32 %v225_v3, %v243_v9  ;;  %v248_v15 = vsub.f32 %v226_v4, %v244_v10 }
  0x20   : > { %v249_v16 = vsub.f32 %v227_v5, %v245_v12  ;;  %v250_v17 = vsub.f32 %v228_v7, %v246_v13  ;;  %630 = vmatpush3.bf16.msra.mxu0 %v704_v19  ;;  %p709_p0 = pneg %p708_p13 }
  0x21   : > { %v251_v18 = vpack.c.bf16 %v248_v15, %v247_v14  ;;  %631 = vmatprep.subr.bf16.mxu0 %v705_v27 }
  0x22   : > { %v252_v20 = vpack.c.bf16 %v250_v17, %v249_v16 }
  0x23   : > { %265 = vrot.lane.b32.xlu0 %v251_v18, %s786_s21  ;;  %v253_v21 = vunpack.c.l.bf16 %v251_v18  ;;  %v254_v22 = vunpack.c.h.bf16 %v251_v18 }
  0x24   : > { %v255_v23 = vunpack.c.l.bf16 %v252_v20  ;;  %v256_v24 = vunpack.c.h.bf16 %v252_v20  ;;  %632 = vmatpush3.bf16.msra.mxu0 %v705_v27 }
  0x25   : > { %v257_v25 = vsub.f32 %v247_v14, %v253_v21  ;;  %v258_v26 = vsub.f32 %v248_v15, %v254_v22 }
  0x26   : > { %v259_v28 = vsub.f32 %v249_v16, %v255_v23  ;;  %v260_v29 = vsub.f32 %v250_v17, %v256_v24 }
  0x27   : > { %v261_v30 = vpack.c.bf16 %v258_v26, %v257_v25  ;;  %267 = vrot.lane.b32.xlu0 %v252_v20, %s786_s21  ;;  %s790_s21 = smov [#allocation2]  }
  0x28   : > { %v262_v31 = vpack.c.bf16 %v260_v29, %v259_v28  ;;  %s710_s23 = sshll.u32 %s790_s21, 4  ;;  %s711_s23 = int_to_ptr.vmem [resolvable:$false] %s710_s23 }
  0x29   : > { %271 = vrot.lane.b32.xlu1 %v261_v30, %s787_s27  ;;  %s712_s26 = scalar_lea.vmem %s711_s23, 1024  ;;  %p713_p1 = scmp.lt.s32.totalorder %s902_s6, %s711_s23 }
  0x2a   : > { %p714_p2 = scmp.lt.s32.totalorder %s712_s26, %s706_s19 }
  0x2c   : > { %p715_p3 = por %p714_p2, %p713_p1 }
  0x2d   : > { %273 = vrot.lane.b32.xlu1 %v262_v31, %s787_s27 }
  0x2e   : > { %p716_p5 = pnand %p715_p3, %p709_p0 }
  0x95   : > { %v266_v32 = vpop.permute.xlu0 %265 }
  0x96   : > { %v278_v33 = vsel %vm275_vm0, %v241_v6, %v266_v32 }
  0x99   : > { %v268_v34 = vpop.permute.xlu0 %267 }
  0x9a   : > { %v281_v37 = vsel %vm275_vm0, %v242_v8, %v268_v34 }
  0x9b   : > { %v272_v35 = vpop.permute.xlu1 %271 }
  0x9c   : > { %v284_v36 = vsel %vm282_vm1, %v278_v33, %v272_v35 }
  0x9d   : > { %633 = vmatprep.mubr.msk.bf16.mxu0 %vm323_vm2, %v284_v36 }
  0x9f   : > { %v274_v38 = vpop.permute.xlu1 %273 }
  0xa0   : > { %v286_v39 = vsel %vm282_vm1, %v281_v37, %v274_v38 }
  0xa1   : > { %634 = vmatmul.mubr.msk.bf16.vlgmr.msra.gmra.mrb[0].mxu0 %vm323_vm2, %v286_v39 }
 0x174   : > { %v635_v40 = vpop.f32.mrb[0].mxu0 }
 0x175   : > { %380 = vst.msk [vmem:[%s191_s4 + $0x10] sm:$0xff] %vm377_vm3, %v635_v40  ;;  %390 = vrot.lane.b32.xlu0 %v635_v40, %s788_s5  ;;  %v362_v41 = vpop.f32.mrb[1].mxu0 }
 0x176   : > { %378 = vst.msk [vmem:[%s191_s4] sm:$0xff] %vm377_vm3, %v362_v41  ;;  %v636_v42 = vpop.f32.mrb[2].mxu0 }
 0x177   : > { %381 = vst.msk [vmem:[%s191_s4 + $0x18] sm:$0xff] %vm377_vm3, %v636_v42  ;;  %392 = vrot.lane.b32.xlu1 %v636_v42, %s788_s5  ;;  %v365_v43 = vpop.f32.mrb[3].mxu0 }
 0x178   : > { %379 = vst.msk [vmem:[%s191_s4 + $0x8] sm:$0xff] %vm377_vm3, %v365_v43 }
 0x179   : > { %406 = vrot.lane.b32.xlu0 %v635_v40, %s789_s7 }
 0x17b   : > { %408 = vrot.lane.b32.xlu1 %v636_v42, %s789_s7 }
 0x17d   : > { %386 = vrot.lane.b32.xlu0 %v362_v41, %s788_s5 }
 0x17f   : > { %388 = vrot.lane.b32.xlu1 %v365_v43, %s788_s5 }
 0x180   : > { %719 = shalt.err (!%p716_p5)
}
 0x181   : > { %s720_s15 = scalar_lea.hbm %s908_s11, 512  ;;  %s724_s30 = scalar_lea.hbm %s976_s2, 1024 }
 0x182   : > { %p721_p6 = scmp.ne.s32.totalorder %s908_s11, %s720_s15  ;;  %p725_p10 = scmp.lt.u32.totalorder %s908_s11, %s976_s2 }
 0x183   : > { %p726_p11 = scmp.lt.u32.totalorder %s724_s30, %s720_s15  ;;  %p728_p13 = scmp.lt.u32.totalorder %s720_s15, %s908_s11 }
 0x184   : > { %p722_p7 = pnand %p721_p6, %p854_p4 }
 0x185   : > { %p727_p12 = por %p726_p11, %p725_p10 }
 0x186   : > { %p723_p9 = pneg %p722_p7 }
 0x187   : > { %p729_p0 = por %p728_p13, %p727_p12 }
 0x189   : > { %p730_p1 = pnand %p729_p0, %p723_p9 }
 0x18b   : > { %733 = shalt.err (!%p730_p1)
}
 0x18c   : > { %s791_s8 = smov 128   ;;  %s792_s9 = smov 8   ;;  %402 = vrot.lane.b32.xlu0 %v362_v41, %s789_s7  ;;  %404 = vrot.lane.b32.xlu1 %v365_v43, %s789_s7 }
 0x18d   : > { %638 = dma.vmem_to_hbm [thread:$0]  (%p854_p4), %s902_s6, 512, %s908_s11, %s910_s18, %s791_s8, %s791_s8, %s792_s9  }
 0x18e   : > { %s793_s10 = smov 104   ;;  %s637_s19 = smul.u32 96, %s874_s28 }
 0x190   : > { %419 = vrot.lane.b32.xlu0 %v362_v41, %s793_s10  ;;  %421 = vrot.lane.b32.xlu1 %v365_v43, %s793_s10  ;;  %s222_s26 = scalar_lea.vmem %s977_s3, %s637_s19 }
 0x194   : > { %423 = vrot.lane.b32.xlu0 %v635_v40, %s793_s10  ;;  %425 = vrot.lane.b32.xlu1 %v636_v42, %s793_s10 }
 0x1e7   : > { %v391_v44 = vpop.permute.xlu0 %390 }
 0x1e8   : > { %400 = vst.msk [vmem:[%s222_s26 + $0x10] sm:$0xff] %vm377_vm3, %v391_v44 }
 0x1e9   : > { %v393_v45 = vpop.permute.xlu1 %392 }
 0x1ea   : > { %401 = vst.msk [vmem:[%s222_s26 + $0x18] sm:$0xff] %vm377_vm3, %v393_v45 }
 0x1eb   : > { %v407_v46 = vpop.permute.xlu0 %406 }
 0x1ec   : > { %600 = vst.msk [vmem:[%s222_s26 + $0x30] sm:$0xff] %vm377_vm3, %v407_v46 }
 0x1ed   : > { %v409_v47 = vpop.permute.xlu1 %408 }
 0x1ee   : > { %601 = vst.msk [vmem:[%s222_s26 + $0x38] sm:$0xff] %vm377_vm3, %v409_v47 }
 0x1ef   : > { %v387_v48 = vpop.permute.xlu0 %386 }
 0x1f0   : > { %398 = vst.msk [vmem:[%s222_s26] sm:$0xff] %vm377_vm3, %v387_v48 }
 0x1f1   : > { %v389_v49 = vpop.permute.xlu1 %388 }
 0x1f2   : > { %399 = vst.msk [vmem:[%s222_s26 + $0x8] sm:$0xff] %vm377_vm3, %v389_v49 }
 0x1fe   : > { %v403_v50 = vpop.permute.xlu0 %402  ;;  %v405_v51 = vpop.permute.xlu1 %404 }
 0x1ff   : > { %598 = vst.msk [vmem:[%s222_s26 + $0x20] sm:$0xff] %vm377_vm3, %v403_v50  ;;  %599 = vst.msk [vmem:[%s222_s26 + $0x28] sm:$0xff] %vm377_vm3, %v405_v51 }
 0x202   : > { %v420_v52 = vpop.permute.xlu0 %419  ;;  %v422_v53 = vpop.permute.xlu1 %421 }
 0x203   : > { %602 = vst.msk [vmem:[%s222_s26 + $0x40] sm:$0xff] %vm377_vm3, %v420_v52  ;;  %603 = vst.msk [vmem:[%s222_s26 + $0x48] sm:$0xff] %vm377_vm3, %v422_v53 }
 0x206   : > { %v424_v54 = vpop.permute.xlu0 %423  ;;  %v426_v55 = vpop.permute.xlu1 %425 }
 0x207   : > { %604 = vst.msk [vmem:[%s222_s26 + $0x50] sm:$0xff] %vm377_vm3, %v424_v54  ;;  %605 = vst.msk [vmem:[%s222_s26 + $0x58] sm:$0xff] %vm377_vm3, %v426_v55 }
 0x208 PF: > { %p644_p4 = scmp.ge.s32.totalorder %s784_s17, 2  ;;  %s480_s22 = sand.u32 1, %s764_s12  }
 0x209   : > { %s481_s28 = scalar_lea.sflag [#allocation3], %s480_s22 }
 0x20a   : > { %p641_p2 = pnand %p644_p4, %p861_p8 }
 0x20c   : > { %759 = dma.done.wait (!%p641_p2), %s481_s28, 512  }
 0x20d   : > { %761 = vsyncadd (!%p641_p2), %s481_s28, 4294966784  ;;  %s17_s17 = sadd.s32 1, %s784_s17   ;;  %s980_s12 = smov %s768_s13 }
 0x20e   : > { %p14_p3 = scmp.ge.s32.totalorder %s17_s17, 4   ;;  %s981_s13 = smov %s772_s14 }
 0x20f   : > { %s982_s14 = smov %s867_s25  ;;  %s983_s15 = smov %s780_s16 }
 0x210   : > { %s984_s16 = smov %s986_s20  ;;  %16 = sbr.rel (!%p14_p3) target bundleno = 4 (0x4), region = 77 }
 0x217   :  { %498 = vsyncpa [#allocation3], 1 }
 0x218   :  { %500 = vsyncpa [#allocation3 + $0x1], 1 }

</bundles_post_ra>
